<compile_context>
chip_gen: v7x
topology: tpu7x:2x2x1
jax: 0.10.0
libtpu: 0.0.40
codegen_flags: <defaults>
</compile_context>

<pallas_src>
import jax
import jax.numpy as jnp
from jax.experimental import pallas as pl
from jax.experimental.pallas import tpu as pltpu


def _leaky_relu(x, slope=0.2):
    return jnp.where(x > 0, x, slope * x)


def discriminator_kernel(x_ref, w1_ref, b1_ref, w2_ref, b2_ref, w3_ref, b3_ref,
                         o_ref):
    """Fused 3-layer MLP + activations for one batch tile.

    x_ref : (TB, 784)  bf16
    w1_ref: (784, 512) bf16,  b1_ref: (1, 512) f32
    w2_ref: (512, 256) bf16,  b2_ref: (1, 256) f32
    w3_ref: (1, 256)   f32,   b3_ref: (1, 1)   f32
    o_ref : (TB, 1)    f32
    """
    x = x_ref[...]                                           # bf16

    # Layer 1: Linear(784 -> 512) + LeakyReLU(0.2)   (bf16 MXU, f32 accum)
    h1 = jnp.dot(x, w1_ref[...], preferred_element_type=jnp.float32)
    h1 = _leaky_relu(h1 + b1_ref[...])

    # Layer 2: Linear(512 -> 256) + LeakyReLU(0.2)
    h2 = jnp.dot(h1.astype(jnp.bfloat16), w2_ref[...],
                 preferred_element_type=jnp.float32)
    h2 = _leaky_relu(h2 + b2_ref[...])

    # Layer 3: Linear(256 -> 1) as VPU multiply + lane reduction (N=1 matmul
    # wastes the MXU), then Sigmoid.
    h3 = jnp.sum(h2 * w3_ref[...], axis=-1, keepdims=True) + b3_ref[...]
    o_ref[...] = jax.nn.sigmoid(h3)


def _batch_tile(B):
    # Fill MXU rows when the batch allows; otherwise round up to the sublane
    # granularity (8).
    if B >= 256:
        return 256
    return max(8, ((B + 7) // 8) * 8)


def discriminator_forward(img, params):
    """img: (B, 1, 28, 28) float32 (NCHW). Returns (B, 1) float32."""
    w1, b1, w2, b2, w3_row, b3 = params
    B = img.shape[0]
    x = img.reshape(B, -1).astype(jnp.bfloat16)              # (B, 784)

    TB = _batch_tile(B)
    Bp = pl.cdiv(B, TB) * TB
    if Bp != B:
        x = jnp.pad(x, ((0, Bp - B), (0, 0)))

    grid = (Bp // TB,)

    # Weights/biases: full-array blocks with constant index maps -> fetched
    # once, VMEM-resident across all batch tiles.
    const_spec = lambda shape: pl.BlockSpec(shape, lambda i: (0,) * len(shape))

    out = pl.pallas_call(
        discriminator_kernel,
        out_shape=jax.ShapeDtypeStruct((Bp, 1), jnp.float32),
        grid=grid,
        in_specs=[
            pl.BlockSpec((TB, 784), lambda i: (i, 0)),       # x tile
            const_spec(w1.shape), const_spec(b1.shape),
            const_spec(w2.shape), const_spec(b2.shape),
            const_spec(w3_row.shape), const_spec(b3.shape),
        ],
        out_specs=pl.BlockSpec((TB, 1), lambda i: (i, 0)),
        compiler_params=pltpu.CompilerParams(
            dimension_semantics=("parallel",)),
    )(x, w1, b1, w2, b2, w3_row, b3)
    return out[:B]


def init_params(key):
    """Deterministic synthetic parameters with the module's shapes."""
    ks = jax.random.split(key, 6)
    # Stored transposed relative to torch: (in_features, out_features).
    w1 = (jax.random.normal(ks[0], (784, 512), jnp.float32) * 0.02
          ).astype(jnp.bfloat16)
    b1 = jax.random.normal(ks[1], (1, 512), jnp.float32) * 0.02
    w2 = (jax.random.normal(ks[2], (512, 256), jnp.float32) * 0.02
          ).astype(jnp.bfloat16)
    b2 = jax.random.normal(ks[3], (1, 256), jnp.float32) * 0.02
    # Final layer weight kept as an f32 row (1, 256) for the VPU reduction.
    w3_row = jax.random.normal(ks[4], (1, 256), jnp.float32) * 0.02
    b3 = jax.random.normal(ks[5], (1, 1), jnp.float32) * 0.02
    return (w1, b1, w2, b2, w3_row, b3)


def reference_forward(img, params):
    """Pure-JAX reference mirroring the kernel's bf16 operand rounding."""
    w1, b1, w2, b2, w3_row, b3 = params
    x = img.reshape(img.shape[0], -1).astype(jnp.bfloat16).astype(jnp.float32)
    h1 = _leaky_relu(x @ w1.astype(jnp.float32) + b1)
    h1 = h1.astype(jnp.bfloat16).astype(jnp.float32)
    h2 = _leaky_relu(h1 @ w2.astype(jnp.float32) + b2)
    h3 = jnp.sum(h2 * w3_row, axis=-1, keepdims=True) + b3
    return jax.nn.sigmoid(h3)


if __name__ == "__main__":
    key = jax.random.PRNGKey(0)
    k_img, k_par = jax.random.split(key)

    B = 8  # small batch
    img = jax.random.normal(k_img, (B, 1, 28, 28), jnp.float32)  # NCHW MNIST
    params = init_params(k_par)

    out = discriminator_forward(img, params)
    out = jax.block_until_ready(out)

    ref = reference_forward(img, params)
    assert out.shape == (B, 1), out.shape
    assert jnp.allclose(out, ref, atol=2e-3, rtol=2e-3), "mismatch vs reference"

    print("KERNEL_OK")
</pallas_src>

<mosaic_0001>
module attributes {stable_mosaic.version = 11 : i64} {
  func.func @discriminator_kernel(%arg0: i32, %arg1: memref<8x784xbf16, #tpu.memory_space<vmem>>, %arg2: memref<784x512xbf16, #tpu.memory_space<vmem>>, %arg3: memref<1x512xf32, #tpu.memory_space<vmem>>, %arg4: memref<512x256xbf16, #tpu.memory_space<vmem>>, %arg5: memref<1x256xf32, #tpu.memory_space<vmem>>, %arg6: memref<1x256xf32, #tpu.memory_space<vmem>>, %arg7: memref<1x1xf32, #tpu.memory_space<vmem>>, %arg8: memref<8x1xf32, #tpu.memory_space<vmem>>) attributes {dimension_semantics = [#tpu.dimension_semantics<parallel>], iteration_bounds = array<i64: 1>, scalar_prefetch = 0 : i64, scratch_operands = 0 : i64, tpu.core_type = #tpu.core_type<tc>, window_params = [{transform_indices = @transform_0, window_bounds = array<i64: 8, 784>}, {pipeline_mode = #tpu.pipeline_mode<synchronous>, transform_indices = @transform_1, window_bounds = array<i64: 784, 512>}, {pipeline_mode = #tpu.pipeline_mode<synchronous>, transform_indices = @transform_2, window_bounds = array<i64: 1, 512>}, {pipeline_mode = #tpu.pipeline_mode<synchronous>, transform_indices = @transform_3, window_bounds = array<i64: 512, 256>}, {pipeline_mode = #tpu.pipeline_mode<synchronous>, transform_indices = @transform_4, window_bounds = array<i64: 1, 256>}, {pipeline_mode = #tpu.pipeline_mode<synchronous>, transform_indices = @transform_5, window_bounds = array<i64: 1, 256>}, {pipeline_mode = #tpu.pipeline_mode<synchronous>, transform_indices = @transform_6, window_bounds = array<i64: 1, 1>}, {transform_indices = @transform_7, window_bounds = array<i64: 8, 1>}]} {
    %c0 = arith.constant 0 : index
    %c0_0 = arith.constant 0 : index
    %0 = vector.load %arg1[%c0, %c0_0] : memref<8x784xbf16, #tpu.memory_space<vmem>>, vector<8x784xbf16>
    %c0_1 = arith.constant 0 : index
    %c0_2 = arith.constant 0 : index
    %1 = vector.load %arg2[%c0_1, %c0_2] : memref<784x512xbf16, #tpu.memory_space<vmem>>, vector<784x512xbf16>
    %cst = arith.constant dense<0.000000e+00> : vector<8x512xf32>
    %2 = tpu.matmul %0, %1, %cst {dimension_numbers = #tpu.dot_dimension_numbers<[1], [0], [0], [1], [0, 0, 1, 1], [], []>} : vector<8x784xbf16>, vector<784x512xbf16>, vector<8x512xf32> -> vector<8x512xf32>
    %c0_3 = arith.constant 0 : index
    %c0_4 = arith.constant 0 : index
    %3 = vector.load %arg3[%c0_3, %c0_4] : memref<1x512xf32, #tpu.memory_space<vmem>>, vector<1x512xf32>
    %4 = vector.broadcast %3 : vector<1x512xf32> to vector<8x512xf32>
    %5 = arith.addf %2, %4 : vector<8x512xf32>
    %cst_5 = arith.constant 0.000000e+00 : f32
    %6 = vector.broadcast %cst_5 : f32 to vector<8x512xf32>
    %7 = arith.cmpf ogt, %5, %6 : vector<8x512xf32>
    %cst_6 = arith.constant 2.000000e-01 : f32
    %8 = vector.broadcast %cst_6 : f32 to vector<8x512xf32>
    %9 = arith.mulf %8, %5 : vector<8x512xf32>
    %10 = arith.select %7, %5, %9 : vector<8x512xi1>, vector<8x512xf32>
    %11 = arith.truncf %10 : vector<8x512xf32> to vector<8x512xbf16>
    %c0_7 = arith.constant 0 : index
    %c0_8 = arith.constant 0 : index
    %12 = vector.load %arg4[%c0_7, %c0_8] : memref<512x256xbf16, #tpu.memory_space<vmem>>, vector<512x256xbf16>
    %cst_9 = arith.constant dense<0.000000e+00> : vector<8x256xf32>
    %13 = tpu.matmul %11, %12, %cst_9 {dimension_numbers = #tpu.dot_dimension_numbers<[1], [0], [0], [1], [0, 0, 1, 1], [], []>} : vector<8x512xbf16>, vector<512x256xbf16>, vector<8x256xf32> -> vector<8x256xf32>
    %c0_10 = arith.constant 0 : index
    %c0_11 = arith.constant 0 : index
    %14 = vector.load %arg5[%c0_10, %c0_11] : memref<1x256xf32, #tpu.memory_space<vmem>>, vector<1x256xf32>
    %15 = vector.broadcast %14 : vector<1x256xf32> to vector<8x256xf32>
    %16 = arith.addf %13, %15 : vector<8x256xf32>
    %cst_12 = arith.constant 0.000000e+00 : f32
    %17 = vector.broadcast %cst_12 : f32 to vector<8x256xf32>
    %18 = arith.cmpf ogt, %16, %17 : vector<8x256xf32>
    %cst_13 = arith.constant 2.000000e-01 : f32
    %19 = vector.broadcast %cst_13 : f32 to vector<8x256xf32>
    %20 = arith.mulf %19, %16 : vector<8x256xf32>
    %21 = arith.select %18, %16, %20 : vector<8x256xi1>, vector<8x256xf32>
    %c0_14 = arith.constant 0 : index
    %c0_15 = arith.constant 0 : index
    %22 = vector.load %arg6[%c0_14, %c0_15] : memref<1x256xf32, #tpu.memory_space<vmem>>, vector<1x256xf32>
    %23 = vector.broadcast %22 : vector<1x256xf32> to vector<8x256xf32>
    %24 = arith.mulf %21, %23 : vector<8x256xf32>
    %cst_16 = arith.constant dense<0.000000e+00> : vector<8xf32>
    %25 = vector.multi_reduction <add>, %24, %cst_16 [1] : vector<8x256xf32> to vector<8xf32>
    %26 = vector.shape_cast %25 : vector<8xf32> to vector<8x1xf32>
    %c0_17 = arith.constant 0 : index
    %c0_18 = arith.constant 0 : index
    %27 = vector.load %arg7[%c0_17, %c0_18] : memref<1x1xf32, #tpu.memory_space<vmem>>, vector<1x1xf32>
    %28 = vector.broadcast %27 : vector<1x1xf32> to vector<8x1xf32>
    %29 = arith.addf %26, %28 : vector<8x1xf32>
    %30 = arith.negf %29 : vector<8x1xf32>
    %31 = math.exp %30 : vector<8x1xf32>
    %cst_19 = arith.constant 1.000000e+00 : f32
    %32 = vector.broadcast %cst_19 : f32 to vector<8x1xf32>
    %33 = arith.addf %32, %31 : vector<8x1xf32>
    %34 = arith.divf %32, %33 : vector<8x1xf32>
    %c0_20 = arith.constant 0 : index
    %c0_21 = arith.constant 0 : index
    %35 = vector.load %arg8[%c0_20, %c0_21] : memref<8x1xf32, #tpu.memory_space<vmem>>, vector<8x1xf32>
    tpu.vector_store %arg8[%c0_20, %c0_21], %34 {strides = array<i32>} : memref<8x1xf32, #tpu.memory_space<vmem>>, vector<8x1xf32>,
    return
  }
  func.func @transform_0(%arg0: i32) -> (i32, i32) {
    %c0_i32 = arith.constant 0 : i32
    %c0_i32_0 = arith.constant 0 : i32
    return %arg0, %c0_i32 : i32, i32
  }
  func.func @transform_1(%arg0: i32) -> (i32, i32) {
    %c0_i32 = arith.constant 0 : i32
    %c0_i32_0 = arith.constant 0 : i32
    %c0_i32_1 = arith.constant 0 : i32
    return %c0_i32, %c0_i32_0 : i32, i32
  }
  func.func @transform_2(%arg0: i32) -> (i32, i32) {
    %c0_i32 = arith.constant 0 : i32
    %c0_i32_0 = arith.constant 0 : i32
    %c0_i32_1 = arith.constant 0 : i32
    return %c0_i32, %c0_i32_0 : i32, i32
  }
  func.func @transform_3(%arg0: i32) -> (i32, i32) {
    %c0_i32 = arith.constant 0 : i32
    %c0_i32_0 = arith.constant 0 : i32
    %c0_i32_1 = arith.constant 0 : i32
    return %c0_i32, %c0_i32_0 : i32, i32
  }
  func.func @transform_4(%arg0: i32) -> (i32, i32) {
    %c0_i32 = arith.constant 0 : i32
    %c0_i32_0 = arith.constant 0 : i32
    %c0_i32_1 = arith.constant 0 : i32
    return %c0_i32, %c0_i32_0 : i32, i32
  }
  func.func @transform_5(%arg0: i32) -> (i32, i32) {
    %c0_i32 = arith.constant 0 : i32
    %c0_i32_0 = arith.constant 0 : i32
    %c0_i32_1 = arith.constant 0 : i32
    return %c0_i32, %c0_i32_0 : i32, i32
  }
  func.func @transform_6(%arg0: i32) -> (i32, i32) {
    %c0_i32 = arith.constant 0 : i32
    %c0_i32_0 = arith.constant 0 : i32
    %c0_i32_1 = arith.constant 0 : i32
    return %c0_i32, %c0_i32_0 : i32, i32
  }
  func.func @transform_7(%arg0: i32) -> (i32, i32) {
    %c0_i32 = arith.constant 0 : i32
    %c0_i32_0 = arith.constant 0 : i32
    return %arg0, %c0_i32 : i32, i32
  }
}

</mosaic_0001>

<bundles_post_ra>
// kernel: tpu_custom_call.1
= control target key start
LH: loop header
LB: loop body
LE: loop exit
PB: predicated region body
PF: predicated region fallthrough
CT: control target
= control target key end

     0   :  { %s3106_s0 = inlined_call_operand.hbm [shape: bf16[8,784], index: 0, kind: input, shape index: {}]   ;;  %s3107_s1 = inlined_call_operand.hbm [shape: bf16[784,512], index: 1, kind: input, shape index: {}]   ;;  %s3108_s2 = inlined_call_operand.vmem [shape: f32[1,512], index: 2, kind: input, shape index: {}]   ;;  %s3109_s3 = inlined_call_operand.hbm [shape: bf16[512,256], index: 3, kind: input, shape index: {}]   ;;  %s3110_s4 = inlined_call_operand.vmem [shape: f32[1,256], index: 4, kind: input, shape index: {}]   ;;  %s3111_s5 = inlined_call_operand.vmem [shape: f32[1,256], index: 5, kind: input, shape index: {}]   ;;  %s3112_s6 = inlined_call_operand.<no memory space> [shape: f32[1,1], index: 6, kind: input, shape index: {}]   ;;  %s3113_s7 = inlined_call_operand.vmem [shape: f32[8,1], index: 7, kind: output, shape index: {}]  }
   0x1   :  { %v12_v0 = vstv %s3112_s6 }
   0x2   :  { %13 = vst [vmem:[#allocation2] sm:$0x1] %v12_v0 }
   0x3   :  { %14 = vsyncpa [#allocation4], 0 }
   0x4   :  { %15 = vsyncpa [#allocation6], 0  ;;  %s2947_s26 = smov [#allocation5]   ;;  %s2877_s30 = scalar_lea.hbm %s3107_s1, 25088 }
   0x5   :  { %s31_s27 = sshll.u32 %s2947_s26, 4  ;;  %p2878_p0 = scmp.ne.s32.totalorder %s3107_s1, %s2877_s30  ;;  %s32_s27 = int_to_ptr.vmem [resolvable:$true] %s31_s27 }
   0x6   :  { %p2881_p1 = scmp.lt.u32.totalorder %s2877_s30, %s3107_s1 }
   0x8   :  { %p2883_p2 = pnand %p2881_p1, %p2878_p0 }
   0xa   :  { %2886 = shalt.err (!%p2883_p2)
}
   0xb   :  { %s2887_s6 = scalar_lea.vmem %s32_s27, 25088  ;;  %p2892_p4 = scmp.lt.s32.totalorder %s32_s27, %s32_s27 }
   0xc   :  { %p2888_p3 = scmp.ne.s32.totalorder %s32_s27, %s2887_s6  ;;  %p2893_p5 = scmp.lt.s32.totalorder %s2887_s6, %s2887_s6 }
   0xe   :  { %p2894_p6 = por %p2893_p5, %p2892_p4 }
  0x10   :  { %p2895_p7 = pnand %p2894_p6, %p2888_p3 }
  0x12   :  { %2898 = shalt.err (!%p2895_p7)
}
  0x13   :  { %s2948_s12 = smov 256   ;;  %s2949_s13 = smov 16  }
  0x14   :  { %37 = dma.hbm_to_vmem [thread:$0]  %s3107_s1, 25088, %s32_s27, [#allocation6], %s2948_s12, %s2948_s12, %s2949_s13  }
  0x15   :  { %s2950_s16 = smov [#allocation3]   ;;  %s2951_s18 = smov [#allocation7]  }
  0x16   :  { %s22_s17 = sshll.u32 %s2950_s16, 4  ;;  %s45_s19 = sshll.u32 %s2951_s18, 4  ;;  %s23_s17 = int_to_ptr.vmem [resolvable:$true] %s22_s17  ;;  %s46_s19 = int_to_ptr.vmem [resolvable:$true] %s45_s19 }
  0x17   :  { %s2899_s22 = scalar_lea.hbm %s3106_s0, 448 }
  0x18   :  { %p2900_p8 = scmp.ne.s32.totalorder %s3106_s0, %s2899_s22  ;;  %p2903_p9 = scmp.lt.u32.totalorder %s2899_s22, %s3106_s0 }
  0x1a   :  { %p2905_p10 = pnand %p2903_p9, %p2900_p8 }
  0x1c   :  { %2908 = shalt.err (!%p2905_p10)
}
  0x1d   :  { %s2909_s1 = scalar_lea.vmem %s23_s17, 448  ;;  %p2914_p12 = scmp.lt.s32.totalorder %s23_s17, %s23_s17 }
  0x1e   :  { %p2910_p11 = scmp.ne.s32.totalorder %s23_s17, %s2909_s1  ;;  %p2915_p13 = scmp.lt.s32.totalorder %s2909_s1, %s2909_s1 }
  0x20   :  { %p2916_p0 = por %p2915_p13, %p2914_p12 }
  0x22   :  { %p2917_p1 = pnand %p2916_p0, %p2910_p11 }
  0x24   :  { %2920 = shalt.err (!%p2917_p1)
}
  0x25   :  { %25 = dma.hbm_to_vmem [thread:$0]  %s3106_s0, 448, %s23_s17, [#allocation4]  }
  0x26   :  { %s2921_s8 = scalar_lea.hbm %s3109_s3, 8192 }
  0x27   :  { %p2922_p2 = scmp.ne.s32.totalorder %s3109_s3, %s2921_s8  ;;  %p2925_p3 = scmp.lt.u32.totalorder %s2921_s8, %s3109_s3 }
  0x29   :  { %p2927_p4 = pnand %p2925_p3, %p2922_p2 }
  0x2b   :  { %2930 = shalt.err (!%p2927_p4)
}
  0x2c   :  { %s2931_s12 = scalar_lea.vmem %s46_s19, 8192  ;;  %p2936_p6 = scmp.lt.s32.totalorder %s46_s19, %s46_s19 }
  0x2d   :  { %p2932_p5 = scmp.ne.s32.totalorder %s46_s19, %s2931_s12  ;;  %p2937_p7 = scmp.lt.s32.totalorder %s2931_s12, %s2931_s12 }
  0x2f   :  { %p2938_p8 = por %p2937_p7, %p2936_p6 }
  0x31   :  { %p2939_p9 = pnand %p2938_p8, %p2932_p5 }
  0x33   :  { %2942 = shalt.err (!%p2939_p9)
}
  0x34   :  { %s2952_s0 = smov 128   ;;  %s2953_s13 = smov 8  }
  0x35   :  { %51 = dma.hbm_to_vmem [thread:$0]  %s3109_s3, 8192, %s46_s19, [#allocation6], %s2952_s0, %s2952_s0, %s2953_s13  }
  0x36   :  { %2943 = dma.done.wait [#allocation4], 448  }
  0x37   :  { %2944 = vsyncadd [#allocation4], 4294966848 }
  0x38   :  { %2945 = dma.done.wait [#allocation6], 33280  }
  0x39   :  { %2946 = vsyncadd [#allocation6], 4294934016  ;;  %v2476_v1 = vld [vmem:[#allocation5 + $0x4] ss:$16 sps:$4 sm:$0xff]   ;;  %v2480_v3 = vld [vmem:[#allocation5] ss:$16 sps:$4 sm:$0xff]  }
  0x3a   :  { %v2478_v2 = vld [vmem:[#allocation5 + $0x204] ss:$16 sps:$4 sm:$0xff]   ;;  %1298 = vmatprep.subr.bf16.mxu1 %v2476_v1  ;;  %v2481_v4 = vld [vmem:[#allocation5 + $0x200] ss:$16 sps:$4 sm:$0xff]   ;;  %vm1294_vm0 = vcmask 130048   ;;  %vm2157_vm7 = vcmask 7168  }
  0x3b   :  { %1339 = vmatprep.subr.bf16.mxu0 %v2478_v2  ;;  %v2482_v5 = vld [vmem:[#allocation5 + $0x24] ss:$16 sps:$4 sm:$0xff]   ;;  %1299 = vmatpush1.bf16.msra.mxu1 %v2480_v3  ;;  %v2486_v7 = vld [vmem:[#allocation5 + $0x20] ss:$16 sps:$4 sm:$0xff]  }
  0x3c   :  { %1340 = vmatpush1.bf16.msra.mxu0 %v2481_v4  ;;  %v2484_v6 = vld [vmem:[#allocation5 + $0x224] ss:$16 sps:$4 sm:$0xff]   ;;  %1300 = vmatprep.subr.bf16.mxu1 %v2482_v5  ;;  %v2487_v8 = vld [vmem:[#allocation5 + $0x220] ss:$16 sps:$4 sm:$0xff]  }
  0x3d   :  { %1341 = vmatprep.subr.bf16.mxu0 %v2484_v6  ;;  %v2488_v9 = vld [vmem:[#allocation5 + $0x44] ss:$16 sps:$4 sm:$0xff]   ;;  %v2492_v11 = vld [vmem:[#allocation5 + $0x40] ss:$16 sps:$4 sm:$0xff]   ;;  %v2581_v6 = vld [vmem:[#allocation5 + $0xc] ss:$16 sps:$4 sm:$0xff]  }
  0x3e   :  { %v2490_v10 = vld [vmem:[#allocation5 + $0x244] ss:$16 sps:$4 sm:$0xff]   ;;  %v2493_v12 = vld [vmem:[#allocation5 + $0x240] ss:$16 sps:$4 sm:$0xff]  }
  0x3f   :  { %1301 = vmatpush1.bf16.msra.mxu1 %v2486_v7  ;;  %v2494_v13 = vld [vmem:[#allocation5 + $0x64] ss:$16 sps:$4 sm:$0xff]   ;;  %v2498_v15 = vld [vmem:[#allocation5 + $0x60] ss:$16 sps:$4 sm:$0xff]  }
  0x40   :  { %1342 = vmatpush1.bf16.msra.mxu0 %v2487_v8  ;;  %1302 = vmatprep.subr.bf16.mxu1 %v2488_v9  ;;  %v2496_v14 = vld [vmem:[#allocation5 + $0x264] ss:$16 sps:$4 sm:$0xff]   ;;  %v2499_v16 = vld [vmem:[#allocation5 + $0x260] ss:$16 sps:$4 sm:$0xff]  }
  0x41   :  { %1343 = vmatprep.subr.bf16.mxu0 %v2490_v10  ;;  %v2500_v17 = vld [vmem:[#allocation5 + $0x84] ss:$16 sps:$4 sm:$0xff]   ;;  %v2504_v19 = vld [vmem:[#allocation5 + $0x80] ss:$16 sps:$4 sm:$0xff]   ;;  %v2579_v10 = vld [vmem:[#allocation5 + $0x8] ss:$16 sps:$4 sm:$0xff]  }
  0x42   :  { %v2502_v18 = vld [vmem:[#allocation5 + $0x284] ss:$16 sps:$4 sm:$0xff]   ;;  %v2505_v20 = vld [vmem:[#allocation5 + $0x280] ss:$16 sps:$4 sm:$0xff]  }
  0x43   :  { %1303 = vmatpush1.bf16.msra.mxu1 %v2492_v11  ;;  %v2506_v21 = vld [vmem:[#allocation5 + $0xa4] ss:$16 sps:$4 sm:$0xff]   ;;  %v2510_v23 = vld [vmem:[#allocation5 + $0xa0] ss:$16 sps:$4 sm:$0xff]  }
  0x44   :  { %1344 = vmatpush1.bf16.msra.mxu0 %v2493_v12  ;;  %1304 = vmatprep.subr.bf16.mxu1 %v2494_v13  ;;  %v2508_v22 = vld [vmem:[#allocation5 + $0x2a4] ss:$16 sps:$4 sm:$0xff]   ;;  %v2511_v24 = vld [vmem:[#allocation5 + $0x2a0] ss:$16 sps:$4 sm:$0xff]   ;;  %v2587_v12 = vld [vmem:[#allocation5 + $0x2c] ss:$16 sps:$4 sm:$0xff]  }
  0x45   :  { %1345 = vmatprep.subr.bf16.mxu0 %v2496_v14  ;;  %v2512_v25 = vld [vmem:[#allocation5 + $0xc4] ss:$16 sps:$4 sm:$0xff]   ;;  %v2516_v27 = vld [vmem:[#allocation5 + $0xc0] ss:$16 sps:$4 sm:$0xff]   ;;  %v2585_v14 = vld [vmem:[#allocation5 + $0x28] ss:$16 sps:$4 sm:$0xff]  }
  0x46   :  { %v2514_v26 = vld [vmem:[#allocation5 + $0x2c4] ss:$16 sps:$4 sm:$0xff]   ;;  %v2517_v28 = vld [vmem:[#allocation5 + $0x2c0] ss:$16 sps:$4 sm:$0xff]  }
  0x47   :  { %1305 = vmatpush1.bf16.msra.mxu1 %v2498_v15  ;;  %v2518_v29 = vld [vmem:[#allocation5 + $0xe4] ss:$16 sps:$4 sm:$0xff]   ;;  %v2522_v31 = vld [vmem:[#allocation5 + $0xe0] ss:$16 sps:$4 sm:$0xff]  }
  0x48   :  { %1346 = vmatpush1.bf16.msra.mxu0 %v2499_v16  ;;  %1306 = vmatprep.subr.bf16.mxu1 %v2500_v17  ;;  %v2520_v30 = vld [vmem:[#allocation5 + $0x2e4] ss:$16 sps:$4 sm:$0xff]   ;;  %v2523_v32 = vld [vmem:[#allocation5 + $0x2e0] ss:$16 sps:$4 sm:$0xff]   ;;  %v2593_v16 = vld [vmem:[#allocation5 + $0x4c] ss:$16 sps:$4 sm:$0xff]  }
  0x49   :  { %1347 = vmatprep.subr.bf16.mxu0 %v2502_v18  ;;  %v2524_v33 = vld [vmem:[#allocation5 + $0x104] ss:$16 sps:$4 sm:$0xff]   ;;  %v2528_v35 = vld [vmem:[#allocation5 + $0x100] ss:$16 sps:$4 sm:$0xff]   ;;  %v2591_v18 = vld [vmem:[#allocation5 + $0x48] ss:$16 sps:$4 sm:$0xff]  }
  0x4a   :  { %v2526_v34 = vld [vmem:[#allocation5 + $0x304] ss:$16 sps:$4 sm:$0xff]   ;;  %v2529_v36 = vld [vmem:[#allocation5 + $0x300] ss:$16 sps:$4 sm:$0xff]  }
  0x4b   :  { %1307 = vmatpush1.bf16.msra.mxu1 %v2504_v19  ;;  %v2530_v37 = vld [vmem:[#allocation5 + $0x124] ss:$16 sps:$4 sm:$0xff]   ;;  %v2534_v39 = vld [vmem:[#allocation5 + $0x120] ss:$16 sps:$4 sm:$0xff]  }
  0x4c   :  { %1348 = vmatpush1.bf16.msra.mxu0 %v2505_v20  ;;  %1308 = vmatprep.subr.bf16.mxu1 %v2506_v21  ;;  %v2532_v38 = vld [vmem:[#allocation5 + $0x324] ss:$16 sps:$4 sm:$0xff]   ;;  %v2535_v40 = vld [vmem:[#allocation5 + $0x320] ss:$16 sps:$4 sm:$0xff]   ;;  %v2599_v20 = vld [vmem:[#allocation5 + $0x6c] ss:$16 sps:$4 sm:$0xff]  }
  0x4d   :  { %1349 = vmatprep.subr.bf16.mxu0 %v2508_v22  ;;  %v2536_v41 = vld [vmem:[#allocation5 + $0x144] ss:$16 sps:$4 sm:$0xff]   ;;  %v2540_v43 = vld [vmem:[#allocation5 + $0x140] ss:$16 sps:$4 sm:$0xff]   ;;  %v2597_v22 = vld [vmem:[#allocation5 + $0x68] ss:$16 sps:$4 sm:$0xff]  }
  0x4e   :  { %v2538_v42 = vld [vmem:[#allocation5 + $0x344] ss:$16 sps:$4 sm:$0xff]   ;;  %v2541_v44 = vld [vmem:[#allocation5 + $0x340] ss:$16 sps:$4 sm:$0xff]  }
  0x4f   :  { %1309 = vmatpush1.bf16.msra.mxu1 %v2510_v23  ;;  %v2542_v45 = vld [vmem:[#allocation5 + $0x164] ss:$16 sps:$4 sm:$0xff]   ;;  %v69_v49 = vld [vmem:[#allocation3 + $0x8] sm:$0xff] }
  0x50   :  { %1350 = vmatpush1.bf16.msra.mxu0 %v2511_v24  ;;  %1310 = vmatprep.subr.bf16.mxu1 %v2512_v25  ;;  %v2544_v46 = vld [vmem:[#allocation5 + $0x364] ss:$16 sps:$4 sm:$0xff]   ;;  %v2546_v50 = vld [vmem:[#allocation5 + $0x160] ss:$16 sps:$4 sm:$0xff]   ;;  %v3036_v52 = vcombine.high %v69_v49, %v69_v49  ;;  %v3042_v8 = vcombine.low %v69_v49, %v69_v49  ;;  %v2605_v24 = vld [vmem:[#allocation5 + $0x8c] ss:$16 sps:$4 sm:$0xff]  }
  0x51   :  { %1351 = vmatprep.subr.bf16.mxu0 %v2514_v26  ;;  %v68_v47 = vld [vmem:[#allocation3] sm:$0xff]  ;;  %v2547_v51 = vld [vmem:[#allocation5 + $0x360] ss:$16 sps:$4 sm:$0xff]  }
  0x52   :  { %v3034_v48 = vcombine.high %v68_v47, %v68_v47  ;;  %v2548_v53 = vld [vmem:[#allocation5 + $0x184] ss:$16 sps:$4 sm:$0xff]   ;;  %1371 = vmatprep.mubr.bf16.mxu0 %v3036_v52  ;;  %v2552_v55 = vld [vmem:[#allocation5 + $0x180] ss:$16 sps:$4 sm:$0xff]   ;;  %v3040_v7 = vcombine.low %v68_v47, %v68_v47  ;;  %v2603_v26 = vld [vmem:[#allocation5 + $0x88] ss:$16 sps:$4 sm:$0xff]  }
  0x53   :  { %1311 = vmatpush1.bf16.msra.mxu1 %v2516_v27  ;;  %v2550_v54 = vld [vmem:[#allocation5 + $0x384] ss:$16 sps:$4 sm:$0xff]   ;;  %v2553_v56 = vld [vmem:[#allocation5 + $0x380] ss:$16 sps:$4 sm:$0xff]  }
  0x54   :  { %1352 = vmatpush1.bf16.msra.mxu0 %v2517_v28  ;;  %1312 = vmatprep.subr.bf16.mxu1 %v2518_v29  ;;  %v2554_v57 = vld [vmem:[#allocation5 + $0x1a4] ss:$16 sps:$4 sm:$0xff]   ;;  %v2558_v59 = vld [vmem:[#allocation5 + $0x1a0] ss:$16 sps:$4 sm:$0xff]   ;;  %v2611_v28 = vld [vmem:[#allocation5 + $0xac] ss:$16 sps:$4 sm:$0xff]  }
  0x55   :  { %1353 = vmatprep.subr.bf16.mxu0 %v2520_v30  ;;  %1330 = vmatprep.mubr.bf16.mxu1 %v3034_v48  ;;  %v2556_v58 = vld [vmem:[#allocation5 + $0x3a4] ss:$16 sps:$4 sm:$0xff]   ;;  %v2559_v60 = vld [vmem:[#allocation5 + $0x3a0] ss:$16 sps:$4 sm:$0xff]   ;;  %v2609_v30 = vld [vmem:[#allocation5 + $0xa8] ss:$16 sps:$4 sm:$0xff]  }
  0x56   :  { %v2560_v61 = vld [vmem:[#allocation5 + $0x1c4] ss:$16 sps:$4 sm:$0xff]   ;;  %v2564_v63 = vld [vmem:[#allocation5 + $0x1c0] ss:$16 sps:$4 sm:$0xff]  }
  0x57   :  { %1313 = vmatpush1.bf16.msra.mxu1 %v2522_v31  ;;  %v2562_v62 = vld [vmem:[#allocation5 + $0x3c4] ss:$16 sps:$4 sm:$0xff]   ;;  %v2565_v0 = vld [vmem:[#allocation5 + $0x3c0] ss:$16 sps:$4 sm:$0xff]  }
  0x58   :  { %1354 = vmatpush1.bf16.msra.mxu0 %v2523_v32  ;;  %1314 = vmatprep.subr.bf16.mxu1 %v2524_v33  ;;  %v2566_v1 = vld [vmem:[#allocation5 + $0x1e4] ss:$16 sps:$4 sm:$0xff]   ;;  %v2570_v3 = vld [vmem:[#allocation5 + $0x1e0] ss:$16 sps:$4 sm:$0xff]   ;;  %v2617_v32 = vld [vmem:[#allocation5 + $0xcc] ss:$16 sps:$4 sm:$0xff]  }
  0x59   :  { %1355 = vmatprep.subr.bf16.mxu0 %v2526_v34  ;;  %v2568_v2 = vld [vmem:[#allocation5 + $0x3e4] ss:$16 sps:$4 sm:$0xff]   ;;  %v2571_v4 = vld [vmem:[#allocation5 + $0x3e0] ss:$16 sps:$4 sm:$0xff]  }
  0x5a   :  { %v2578_v5 = vld [vmem:[#allocation5 + $0x404] ss:$16 sps:$4 sm:$0xff]   ;;  %v2576_v9 = vld [vmem:[#allocation5 + $0x400] ss:$16 sps:$4 sm:$0xff]  }
  0x5b   :  { %1315 = vmatpush1.bf16.msra.mxu1 %v2528_v35  ;;  %v2584_v11 = vld [vmem:[#allocation5 + $0x424] ss:$16 sps:$4 sm:$0xff]   ;;  %v2582_v13 = vld [vmem:[#allocation5 + $0x420] ss:$16 sps:$4 sm:$0xff]  }
  0x5c   :  { %1356 = vmatpush1.bf16.msra.mxu0 %v2529_v36  ;;  %1316 = vmatprep.subr.bf16.mxu1 %v2530_v37  ;;  %v2590_v15 = vld [vmem:[#allocation5 + $0x444] ss:$16 sps:$4 sm:$0xff]   ;;  %v2588_v17 = vld [vmem:[#allocation5 + $0x440] ss:$16 sps:$4 sm:$0xff]   ;;  %v2615_v36 = vld [vmem:[#allocation5 + $0xc8] ss:$16 sps:$4 sm:$0xff]  }
  0x5d   :  { %1357 = vmatprep.subr.bf16.mxu0 %v2532_v38  ;;  %v2596_v19 = vld [vmem:[#allocation5 + $0x464] ss:$16 sps:$4 sm:$0xff]   ;;  %v2594_v21 = vld [vmem:[#allocation5 + $0x460] ss:$16 sps:$4 sm:$0xff]   ;;  %v2623_v38 = vld [vmem:[#allocation5 + $0xec] ss:$16 sps:$4 sm:$0xff]  }
  0x5e   :  { %v2602_v23 = vld [vmem:[#allocation5 + $0x484] ss:$16 sps:$4 sm:$0xff]   ;;  %v2600_v25 = vld [vmem:[#allocation5 + $0x480] ss:$16 sps:$4 sm:$0xff]  }
  0x5f   :  { %1317 = vmatpush1.bf16.msra.mxu1 %v2534_v39  ;;  %v2608_v27 = vld [vmem:[#allocation5 + $0x4a4] ss:$16 sps:$4 sm:$0xff]   ;;  %v2606_v29 = vld [vmem:[#allocation5 + $0x4a0] ss:$16 sps:$4 sm:$0xff]  }
  0x60   :  { %1358 = vmatpush1.bf16.msra.mxu0 %v2535_v40  ;;  %1318 = vmatprep.subr.bf16.mxu1 %v2536_v41  ;;  %v2614_v31 = vld [vmem:[#allocation5 + $0x4c4] ss:$16 sps:$4 sm:$0xff]   ;;  %v2612_v34 = vld [vmem:[#allocation5 + $0x4c0] ss:$16 sps:$4 sm:$0xff]   ;;  %v2621_v40 = vld [vmem:[#allocation5 + $0xe8] ss:$16 sps:$4 sm:$0xff]  }
  0x61   :  { %1359 = vmatprep.subr.bf16.mxu0 %v2538_v42  ;;  %v3047_v33 = vld [vmem:[#allocation3 + $0x10] sm:$0xff]  ;;  %v2618_v39 = vld [vmem:[#allocation5 + $0x4e0] ss:$16 sps:$4 sm:$0xff]   ;;  %v2629_v42 = vld [vmem:[#allocation5 + $0x10c] ss:$16 sps:$4 sm:$0xff]  }
  0x62   :  { %v3051_v35 = vcombine.high %v3047_v33, %v3047_v33  ;;  %v2620_v37 = vld [vmem:[#allocation5 + $0x4e4] ss:$16 sps:$4 sm:$0xff]   ;;  %v2630_v47 = vld [vmem:[#allocation5 + $0x520] ss:$16 sps:$4 sm:$0xff]  }
  0x63   :  { %1319 = vmatpush1.bf16.msra.mxu1 %v2540_v43  ;;  %v2626_v41 = vld [vmem:[#allocation5 + $0x504] ss:$16 sps:$4 sm:$0xff]   ;;  %v2624_v43 = vld [vmem:[#allocation5 + $0x500] ss:$16 sps:$4 sm:$0xff]  }
  0x64   :  { %1360 = vmatpush1.bf16.msra.mxu0 %v2541_v44  ;;  %1320 = vmatprep.subr.bf16.mxu1 %v2542_v45  ;;  %v2627_v44 = vld [vmem:[#allocation5 + $0x108] ss:$16 sps:$4 sm:$0xff]   ;;  %v2632_v45 = vld [vmem:[#allocation5 + $0x524] ss:$16 sps:$4 sm:$0xff]  }
  0x65   :  { %1361 = vmatprep.subr.bf16.mxu0 %v2544_v46  ;;  %v2635_v46 = vld [vmem:[#allocation5 + $0x12c] ss:$16 sps:$4 sm:$0xff]   ;;  %v2638_v49 = vld [vmem:[#allocation5 + $0x544] ss:$16 sps:$4 sm:$0xff]  }
  0x67   :  { %1321 = vmatpush1.bf16.msra.mxu1 %v2546_v50  ;;  %v2641_v50 = vld [vmem:[#allocation5 + $0x14c] ss:$16 sps:$4 sm:$0xff]  }
  0x68   :  { %1362 = vmatpush1.bf16.msra.mxu0 %v2547_v51  ;;  %1322 = vmatprep.subr.bf16.mxu1 %v2548_v53  ;;  %v2636_v51 = vld [vmem:[#allocation5 + $0x540] ss:$16 sps:$4 sm:$0xff]   ;;  %v2639_v53 = vld [vmem:[#allocation5 + $0x148] ss:$16 sps:$4 sm:$0xff]  }
  0x69   :  { %1363 = vmatprep.subr.bf16.mxu0 %v2550_v54  ;;  %v2644_v54 = vld [vmem:[#allocation5 + $0x564] ss:$16 sps:$4 sm:$0xff]  }
  0x6b   :  { %1323 = vmatpush1.bf16.msra.mxu1 %v2552_v55  ;;  %v2647_v55 = vld [vmem:[#allocation5 + $0x16c] ss:$16 sps:$4 sm:$0xff]  }
  0x6c   :  { %1364 = vmatpush1.bf16.msra.mxu0 %v2553_v56  ;;  %1324 = vmatprep.subr.bf16.mxu1 %v2554_v57  ;;  %v2642_v56 = vld [vmem:[#allocation5 + $0x560] ss:$16 sps:$4 sm:$0xff]   ;;  %v2645_v57 = vld [vmem:[#allocation5 + $0x168] ss:$16 sps:$4 sm:$0xff]  }
  0x6d   :  { %1365 = vmatprep.subr.bf16.mxu0 %v2556_v58  ;;  %v2650_v58 = vld [vmem:[#allocation5 + $0x584] ss:$16 sps:$4 sm:$0xff]  }
  0x6f   :  { %1325 = vmatpush1.bf16.msra.mxu1 %v2558_v59  ;;  %v2653_v59 = vld [vmem:[#allocation5 + $0x18c] ss:$16 sps:$4 sm:$0xff]  }
  0x70   :  { %1366 = vmatpush1.bf16.msra.mxu0 %v2559_v60  ;;  %1326 = vmatprep.subr.bf16.mxu1 %v2560_v61  ;;  %v2648_v60 = vld [vmem:[#allocation5 + $0x580] ss:$16 sps:$4 sm:$0xff]   ;;  %v2651_v61 = vld [vmem:[#allocation5 + $0x188] ss:$16 sps:$4 sm:$0xff]  }
  0x71   :  { %1367 = vmatprep.subr.bf16.mxu0 %v2562_v62  ;;  %v2656_v62 = vld [vmem:[#allocation5 + $0x5a4] ss:$16 sps:$4 sm:$0xff]  }
  0x73   :  { %1327 = vmatpush1.bf16.msra.mxu1 %v2564_v63  ;;  %v2659_v63 = vld [vmem:[#allocation5 + $0x1ac] ss:$16 sps:$4 sm:$0xff]  }
  0x74   :  { %1368 = vmatpush1.bf16.msra.mxu0 %v2565_v0  ;;  %1328 = vmatprep.subr.bf16.mxu1 %v2566_v1  ;;  %v2654_v0 = vld [vmem:[#allocation5 + $0x5a0] ss:$16 sps:$4 sm:$0xff]   ;;  %v2657_v1 = vld [vmem:[#allocation5 + $0x1a8] ss:$16 sps:$4 sm:$0xff]  }
  0x75   :  { %1369 = vmatprep.subr.bf16.mxu0 %v2568_v2  ;;  %v2662_v2 = vld [vmem:[#allocation5 + $0x5c4] ss:$16 sps:$4 sm:$0xff]  }
  0x77   :  { %1329 = vmatpush1.bf16.msra.mxu1 %v2570_v3  ;;  %v2665_v3 = vld [vmem:[#allocation5 + $0x1cc] ss:$16 sps:$4 sm:$0xff]  }
  0x78   :  { %1370 = vmatpush1.bf16.msra.mxu0 %v2571_v4  ;;  %1462 = vmatprep.subr.bf16.mxu1 %v2581_v6  ;;  %v2660_v4 = vld [vmem:[#allocation5 + $0x5c0] ss:$16 sps:$4 sm:$0xff]   ;;  %v2668_v6 = vld [vmem:[#allocation5 + $0x5e4] ss:$16 sps:$4 sm:$0xff]  }
  0x79   :  { %1380 = vmatprep.subr.bf16.mxu0 %v2578_v5  ;;  %v2663_v5 = vld [vmem:[#allocation5 + $0x1c8] ss:$16 sps:$4 sm:$0xff]  }
  0x7a   :  { %1331 = vmatmul.mubr.bf16.vlgmr.msra.gmra.mrb[0].mxu1 %v3040_v7 }
  0x7b   :  { %1372 = vmatmul.mubr.bf16.vlgmr.msra.gmra.mrb[0].mxu0 %v3042_v8  ;;  %1463 = vmatpush1.bf16.msra.mxu1 %v2579_v10  ;;  %v2666_v10 = vld [vmem:[#allocation5 + $0x5e0] ss:$16 sps:$4 sm:$0xff]  }
  0x7c   :  { %1381 = vmatpush1.bf16.msra.mxu0 %v2576_v9  ;;  %1464 = vmatprep.subr.bf16.mxu1 %v2587_v12  ;;  %v2671_v9 = vld [vmem:[#allocation5 + $0x1ec] ss:$16 sps:$4 sm:$0xff]  }
  0x7d   :  { %1382 = vmatprep.subr.bf16.mxu0 %v2584_v11  ;;  %1494 = vmatprep.mubr.bf16.mxu1 %v3034_v48  ;;  %v2633_v48 = vld [vmem:[#allocation5 + $0x128] ss:$16 sps:$4 sm:$0xff]   ;;  %v2676_v12 = vld [vmem:[#allocation5 + $0x20c] ss:$16 sps:$4 sm:$0xff]  }
  0x7e   :  { %1412 = vmatprep.mubr.bf16.mxu0 %v3051_v35  ;;  %v2669_v11 = vld [vmem:[#allocation5 + $0x1e8] ss:$16 sps:$4 sm:$0xff]  }
  0x7f   :  { %1465 = vmatpush1.bf16.msra.mxu1 %v2585_v14  ;;  %v3056_v14 = vcombine.low %v3047_v33, %v3047_v33  ;;  %v2699_v33 = vld [vmem:[#allocation5 + $0x2e8] ss:$16 sps:$4 sm:$0xff]  }
  0x80   :  { %1383 = vmatpush1.bf16.msra.mxu0 %v2582_v13  ;;  %1466 = vmatprep.subr.bf16.mxu1 %v2593_v16  ;;  %v2682_v13 = vld [vmem:[#allocation5 + $0x604] ss:$16 sps:$4 sm:$0xff]   ;;  %v2680_v16 = vld [vmem:[#allocation5 + $0x600] ss:$16 sps:$4 sm:$0xff]  }
  0x81   :  { %1384 = vmatprep.subr.bf16.mxu0 %v2590_v15  ;;  %v2674_v15 = vld [vmem:[#allocation5 + $0x208] ss:$16 sps:$4 sm:$0xff]  }
  0x83   :  { %1467 = vmatpush1.bf16.msra.mxu1 %v2591_v18  ;;  %v2677_v18 = vld [vmem:[#allocation5 + $0x228] ss:$16 sps:$4 sm:$0xff]  }
  0x84   :  { %1385 = vmatpush1.bf16.msra.mxu0 %v2588_v17  ;;  %1468 = vmatprep.subr.bf16.mxu1 %v2599_v20  ;;  %v2679_v17 = vld [vmem:[#allocation5 + $0x22c] ss:$16 sps:$4 sm:$0xff]   ;;  %v2954_v20 = vmov 0  }
  0x85   :  { %1386 = vmatprep.subr.bf16.mxu0 %v2596_v19  ;;  %v2685_v19 = vld [vmem:[#allocation5 + $0x24c] ss:$16 sps:$4 sm:$0xff]  }
  0x87   :  { %1469 = vmatpush1.bf16.msra.mxu1 %v2597_v22  ;;  %v2689_v22 = vld [vmem:[#allocation5 + $0x26c] ss:$16 sps:$4 sm:$0xff]  }
  0x88   :  { %1387 = vmatpush1.bf16.msra.mxu0 %v2594_v21  ;;  %1470 = vmatprep.subr.bf16.mxu1 %v2605_v24  ;;  %v2683_v21 = vld [vmem:[#allocation5 + $0x248] ss:$16 sps:$4 sm:$0xff]  }
  0x89   :  { %1388 = vmatprep.subr.bf16.mxu0 %v2602_v23  ;;  %v3062_v23 = vld [vmem:[#allocation3 + $0x18] ss:$0 sps:$4 sm:$0xff]   ;;  %v2687_v24 = vld [vmem:[#allocation5 + $0x268] ss:$16 sps:$4 sm:$0xff]  }
  0x8b   :  { %1471 = vmatpush1.bf16.msra.mxu1 %v2603_v26  ;;  %v2695_v26 = vld [vmem:[#allocation5 + $0x2ac] ss:$16 sps:$4 sm:$0xff]  }
  0x8c   :  { %1389 = vmatpush1.bf16.msra.mxu0 %v2600_v25  ;;  %1472 = vmatprep.subr.bf16.mxu1 %v2611_v28  ;;  %v2692_v25 = vld [vmem:[#allocation5 + $0x28c] ss:$16 sps:$4 sm:$0xff]  }
  0x8d   :  { %1390 = vmatprep.subr.bf16.mxu0 %v2608_v27  ;;  %v2693_v27 = vld [vmem:[#allocation5 + $0x2a8] ss:$16 sps:$4 sm:$0xff]   ;;  %v2698_v28 = vld [vmem:[#allocation5 + $0x2cc] ss:$16 sps:$4 sm:$0xff]  }
  0x8f   :  { %1473 = vmatpush1.bf16.msra.mxu1 %v2609_v30  ;;  %v2777_v30 = vld [vmem:[#allocation7] ss:$8 sps:$4 sm:$0xff]  }
  0x90   :  { %1391 = vmatpush1.bf16.msra.mxu0 %v2606_v29  ;;  %1474 = vmatprep.subr.bf16.mxu1 %v2617_v32  ;;  %v2701_v29 = vld [vmem:[#allocation5 + $0x2ec] ss:$16 sps:$4 sm:$0xff]  }
  0x91   :  { %1392 = vmatprep.subr.bf16.mxu0 %v2614_v31  ;;  %v2779_v31 = vld [vmem:[#allocation7 + $0x4] ss:$8 sps:$4 sm:$0xff]   ;;  %v2782_v32 = vld [vmem:[#allocation7 + $0x14] ss:$8 sps:$4 sm:$0xff]  }
  0x93   :  { %1475 = vmatpush1.bf16.msra.mxu1 %v2615_v36  ;;  %v2704_v36 = vld [vmem:[#allocation5 + $0x30c] ss:$16 sps:$4 sm:$0xff]  }
  0x94   :  { %1393 = vmatpush1.bf16.msra.mxu0 %v2612_v34  ;;  %1476 = vmatprep.subr.bf16.mxu1 %v2623_v38  ;;  %v2780_v34 = vld [vmem:[#allocation7 + $0x10] ss:$8 sps:$4 sm:$0xff]  }
  0x95   :  { %1394 = vmatprep.subr.bf16.mxu0 %v2620_v37  ;;  %v2785_v37 = vld [vmem:[#allocation7 + $0x24] ss:$8 sps:$4 sm:$0xff]   ;;  %v2702_v38 = vld [vmem:[#allocation5 + $0x308] ss:$16 sps:$4 sm:$0xff]  }
  0x97   :  { %1477 = vmatpush1.bf16.msra.mxu1 %v2621_v40  ;;  %v2707_v40 = vld [vmem:[#allocation5 + $0x32c] ss:$16 sps:$4 sm:$0xff]  }
  0x98   :  { %1395 = vmatpush1.bf16.msra.mxu0 %v2618_v39  ;;  %1478 = vmatprep.subr.bf16.mxu1 %v2629_v42  ;;  %v2783_v39 = vld [vmem:[#allocation7 + $0x20] ss:$8 sps:$4 sm:$0xff]  }
  0x99   :  { %1396 = vmatprep.subr.bf16.mxu0 %v2626_v41  ;;  %v2788_v41 = vld [vmem:[#allocation7 + $0x34] ss:$8 sps:$4 sm:$0xff]   ;;  %v2705_v42 = vld [vmem:[#allocation5 + $0x328] ss:$16 sps:$4 sm:$0xff]  }
  0x9b   :  { %1479 = vmatpush1.bf16.msra.mxu1 %v2627_v44  ;;  %v2710_v44 = vld [vmem:[#allocation5 + $0x34c] ss:$16 sps:$4 sm:$0xff]  }
  0x9c   :  { %1397 = vmatpush1.bf16.msra.mxu0 %v2624_v43  ;;  %1480 = vmatprep.subr.bf16.mxu1 %v2635_v46  ;;  %v2786_v43 = vld [vmem:[#allocation7 + $0x30] ss:$8 sps:$4 sm:$0xff]  }
  0x9d   :  { %1398 = vmatprep.subr.bf16.mxu0 %v2632_v45  ;;  %v2791_v45 = vld [vmem:[#allocation7 + $0x44] ss:$8 sps:$4 sm:$0xff]   ;;  %v2708_v46 = vld [vmem:[#allocation5 + $0x348] ss:$16 sps:$4 sm:$0xff]  }
  0x9f   :  { %1481 = vmatpush1.bf16.msra.mxu1 %v2633_v48  ;;  %v2713_v48 = vld [vmem:[#allocation5 + $0x36c] ss:$16 sps:$4 sm:$0xff]  }
  0xa0   :  { %1399 = vmatpush1.bf16.msra.mxu0 %v2630_v47  ;;  %1482 = vmatprep.subr.bf16.mxu1 %v2641_v50  ;;  %v2789_v47 = vld [vmem:[#allocation7 + $0x40] ss:$8 sps:$4 sm:$0xff]  }
  0xa1   :  { %1400 = vmatprep.subr.bf16.mxu0 %v2638_v49  ;;  %v2794_v49 = vld [vmem:[#allocation7 + $0x54] ss:$8 sps:$4 sm:$0xff]   ;;  %v2711_v50 = vld [vmem:[#allocation5 + $0x368] ss:$16 sps:$4 sm:$0xff]  }
  0xa3   :  { %1483 = vmatpush1.bf16.msra.mxu1 %v2639_v53  ;;  %v2716_v53 = vld [vmem:[#allocation5 + $0x38c] ss:$16 sps:$4 sm:$0xff]  }
  0xa4   :  { %1401 = vmatpush1.bf16.msra.mxu0 %v2636_v51  ;;  %1484 = vmatprep.subr.bf16.mxu1 %v2647_v55  ;;  %v2792_v51 = vld [vmem:[#allocation7 + $0x50] ss:$8 sps:$4 sm:$0xff]  }
  0xa5   :  { %1402 = vmatprep.subr.bf16.mxu0 %v2644_v54  ;;  %v2797_v54 = vld [vmem:[#allocation7 + $0x64] ss:$8 sps:$4 sm:$0xff]   ;;  %v2714_v55 = vld [vmem:[#allocation5 + $0x388] ss:$16 sps:$4 sm:$0xff]  }
  0xa7   :  { %1485 = vmatpush1.bf16.msra.mxu1 %v2645_v57  ;;  %v2719_v57 = vld [vmem:[#allocation5 + $0x3ac] ss:$16 sps:$4 sm:$0xff]  }
  0xa8   :  { %1403 = vmatpush1.bf16.msra.mxu0 %v2642_v56  ;;  %1486 = vmatprep.subr.bf16.mxu1 %v2653_v59  ;;  %v2795_v56 = vld [vmem:[#allocation7 + $0x60] ss:$8 sps:$4 sm:$0xff]  }
  0xa9   :  { %1404 = vmatprep.subr.bf16.mxu0 %v2650_v58  ;;  %v2800_v58 = vld [vmem:[#allocation7 + $0x74] ss:$8 sps:$4 sm:$0xff]   ;;  %v2717_v59 = vld [vmem:[#allocation5 + $0x3a8] ss:$16 sps:$4 sm:$0xff]  }
  0xab   :  { %1487 = vmatpush1.bf16.msra.mxu1 %v2651_v61  ;;  %v2722_v61 = vld [vmem:[#allocation5 + $0x3cc] ss:$16 sps:$4 sm:$0xff]  }
  0xac   :  { %1405 = vmatpush1.bf16.msra.mxu0 %v2648_v60  ;;  %1488 = vmatprep.subr.bf16.mxu1 %v2659_v63  ;;  %v2798_v60 = vld [vmem:[#allocation7 + $0x70] ss:$8 sps:$4 sm:$0xff]  }
  0xad   :  { %1406 = vmatprep.subr.bf16.mxu0 %v2656_v62  ;;  %v2803_v62 = vld [vmem:[#allocation7 + $0x84] ss:$8 sps:$4 sm:$0xff]   ;;  %v2720_v63 = vld [vmem:[#allocation5 + $0x3c8] ss:$16 sps:$4 sm:$0xff]  }
  0xaf   :  { %1489 = vmatpush1.bf16.msra.mxu1 %v2657_v1  ;;  %v2725_v1 = vld [vmem:[#allocation5 + $0x3ec] ss:$16 sps:$4 sm:$0xff]  }
  0xb0   :  { %1407 = vmatpush1.bf16.msra.mxu0 %v2654_v0  ;;  %1490 = vmatprep.subr.bf16.mxu1 %v2665_v3  ;;  %v2801_v0 = vld [vmem:[#allocation7 + $0x80] ss:$8 sps:$4 sm:$0xff]  }
  0xb1   :  { %1408 = vmatprep.subr.bf16.mxu0 %v2662_v2  ;;  %v2806_v2 = vld [vmem:[#allocation7 + $0x94] ss:$8 sps:$4 sm:$0xff]   ;;  %v2723_v3 = vld [vmem:[#allocation5 + $0x3e8] ss:$16 sps:$4 sm:$0xff]  }
  0xb3   :  { %1491 = vmatpush1.bf16.msra.mxu1 %v2663_v5  ;;  %v2728_v5 = vld [vmem:[#allocation5 + $0x40c] ss:$16 sps:$4 sm:$0xff]  }
  0xb4   :  { %1409 = vmatpush1.bf16.msra.mxu0 %v2660_v4  ;;  %1492 = vmatprep.subr.bf16.mxu1 %v2671_v9  ;;  %v2804_v4 = vld [vmem:[#allocation7 + $0x90] ss:$8 sps:$4 sm:$0xff]  }
  0xb5   :  { %1410 = vmatprep.subr.bf16.mxu0 %v2668_v6  ;;  %v2809_v6 = vld [vmem:[#allocation7 + $0xa4] ss:$8 sps:$4 sm:$0xff]   ;;  %v2726_v9 = vld [vmem:[#allocation5 + $0x408] ss:$16 sps:$4 sm:$0xff]  }
  0xb7   :  { %1493 = vmatpush1.bf16.msra.mxu1 %v2669_v11  ;;  %v2807_v11 = vld [vmem:[#allocation7 + $0xa0] ss:$8 sps:$4 sm:$0xff]  }
  0xb8   :  { %1411 = vmatpush1.bf16.msra.mxu0 %v2666_v10  ;;  %1503 = vmatprep.subr.bf16.mxu1 %v2676_v12  ;;  %v2731_v10 = vld [vmem:[#allocation5 + $0x42c] ss:$16 sps:$4 sm:$0xff]  }
  0xb9   :  { %1421 = vmatprep.subr.bf16.mxu0 %v2682_v13  ;;  %v2812_v12 = vld [vmem:[#allocation7 + $0xb4] ss:$8 sps:$4 sm:$0xff]   ;;  %v2729_v13 = vld [vmem:[#allocation5 + $0x428] ss:$16 sps:$4 sm:$0xff]  }
  0xba   :  { %1495 = vmatmul.mubr.bf16.vlgmr.msra.gmra.mrb[4].mxu1 %v3040_v7  ;;  %v2690_v7 = vld [vmem:[#allocation5 + $0x288] ss:$16 sps:$4 sm:$0xff]  }
  0xbb   :  { %1413 = vmatmul.mubr.bf16.vlgmr.msra.gmra.mrb[0].mxu0 %v3056_v14  ;;  %1504 = vmatpush1.bf16.msra.mxu1 %v2674_v15  ;;  %v2734_v15 = vld [vmem:[#allocation5 + $0x44c] ss:$16 sps:$4 sm:$0xff]  }
  0xbc   :  { %1422 = vmatpush1.bf16.msra.mxu0 %v2680_v16  ;;  %1505 = vmatprep.subr.bf16.mxu1 %v2679_v17  ;;  %v2810_v16 = vld [vmem:[#allocation7 + $0xb0] ss:$8 sps:$4 sm:$0xff]   ;;  %v2815_v17 = vld [vmem:[#allocation7 + $0xc4] ss:$8 sps:$4 sm:$0xff]  }
  0xbd   :  { %1453 = vmatprep.mubr.bf16.mxu0 %v2954_v20  ;;  %1535 = vmatprep.mubr.bf16.mxu1 %v3036_v52  ;;  %v2696_v52 = vld [vmem:[#allocation5 + $0x2c8] ss:$16 sps:$4 sm:$0xff]  }
  0xbe   :  { %2038 = vmatprep.subr.bf16.mxu0 %v2779_v31  ;;  %v2750_v31 = vld [vmem:[#allocation5 + $0x508] ss:$16 sps:$4 sm:$0xff]  }
  0xbf   :  { %1506 = vmatpush1.bf16.msra.mxu1 %v2677_v18  ;;  %v2732_v18 = vld [vmem:[#allocation5 + $0x448] ss:$16 sps:$4 sm:$0xff]  }
  0xc0   :  { %1507 = vmatprep.subr.bf16.mxu1 %v2685_v19  ;;  %v2737_v19 = vld [vmem:[#allocation5 + $0x46c] ss:$16 sps:$4 sm:$0xff]  }
  0xc3   :  { %1508 = vmatpush1.bf16.msra.mxu1 %v2683_v21  ;;  %v2813_v21 = vld [vmem:[#allocation7 + $0xc0] ss:$8 sps:$4 sm:$0xff]  }
  0xc4   :  { %1509 = vmatprep.subr.bf16.mxu1 %v2689_v22  ;;  %v2818_v22 = vld [vmem:[#allocation7 + $0xd4] ss:$8 sps:$4 sm:$0xff]  }
  0xc7   :  { %2368 = vmatmul.mubr.msk.bf16.vlgmr.msra.gmra.mrb[0].mxu0 %vm1294_vm0, %v3062_v23  ;;  %1510 = vmatpush1.bf16.msra.mxu1 %v2687_v24  ;;  %v2740_v24 = vld [vmem:[#allocation5 + $0x48c] ss:$16 sps:$4 sm:$0xff]  }
  0xc8   :  { %1511 = vmatprep.subr.bf16.mxu1 %v2692_v25  ;;  %2039 = vmatpush1.bf16.msra.mxu0 %v2777_v30  ;;  %v2738_v25 = vld [vmem:[#allocation5 + $0x488] ss:$16 sps:$4 sm:$0xff]   ;;  %v2752_v30 = vld [vmem:[#allocation5 + $0x50c] ss:$16 sps:$4 sm:$0xff]  }
  0xc9   :  { %2040 = vmatprep.subr.bf16.mxu0 %v2782_v32  ;;  %v2755_v32 = vld [vmem:[#allocation5 + $0x52c] ss:$16 sps:$4 sm:$0xff]  }
  0xcb   :  { %1512 = vmatpush1.bf16.msra.mxu1 %v2690_v7  ;;  %v2743_v7 = vld [vmem:[#allocation5 + $0x4ac] ss:$16 sps:$4 sm:$0xff]  }
  0xcc   :  { %1513 = vmatprep.subr.bf16.mxu1 %v2695_v26  ;;  %2041 = vmatpush1.bf16.msra.mxu0 %v2780_v34  ;;  %v2741_v26 = vld [vmem:[#allocation5 + $0x4a8] ss:$16 sps:$4 sm:$0xff]  }
  0xcd   :  { %2042 = vmatprep.subr.bf16.mxu0 %v2785_v37  ;;  %v2819_v34 = vld [vmem:[#allocation7 + $0xe0] ss:$8 sps:$4 sm:$0xff]   ;;  %v2758_v37 = vld [vmem:[#allocation5 + $0x54c] ss:$16 sps:$4 sm:$0xff]  }
  0xcf   :  { %1514 = vmatpush1.bf16.msra.mxu1 %v2693_v27  ;;  %v2746_v27 = vld [vmem:[#allocation5 + $0x4cc] ss:$16 sps:$4 sm:$0xff]  }
  0xd0   :  { %1515 = vmatprep.subr.bf16.mxu1 %v2698_v28  ;;  %2043 = vmatpush1.bf16.msra.mxu0 %v2783_v39  ;;  %v2744_v28 = vld [vmem:[#allocation5 + $0x4c8] ss:$16 sps:$4 sm:$0xff]  }
  0xd1   :  { %2044 = vmatprep.subr.bf16.mxu0 %v2788_v41  ;;  %v2822_v39 = vld [vmem:[#allocation7 + $0xf0] ss:$8 sps:$4 sm:$0xff]   ;;  %v2761_v41 = vld [vmem:[#allocation5 + $0x56c] ss:$16 sps:$4 sm:$0xff]  }
  0xd3   :  { %1516 = vmatpush1.bf16.msra.mxu1 %v2696_v52  ;;  %v2749_v52 = vld [vmem:[#allocation5 + $0x4ec] ss:$16 sps:$4 sm:$0xff]  }
  0xd4   :  { %1517 = vmatprep.subr.bf16.mxu1 %v2701_v29  ;;  %2045 = vmatpush1.bf16.msra.mxu0 %v2786_v43  ;;  %v2747_v29 = vld [vmem:[#allocation5 + $0x4e8] ss:$16 sps:$4 sm:$0xff]   ;;  %v2827_v43 = vld [vmem:[#allocation7 + $0x104] ss:$8 sps:$4 sm:$0xff]  }
  0xd5   :  { %2046 = vmatprep.subr.bf16.mxu0 %v2791_v45  ;;  %v2762_v45 = vld [vmem:[#allocation5 + $0x588] ss:$16 sps:$4 sm:$0xff]  }
  0xd7   :  { %1518 = vmatpush1.bf16.msra.mxu1 %v2699_v33  ;;  %v2821_v33 = vld [vmem:[#allocation7 + $0xe4] ss:$8 sps:$4 sm:$0xff]  }
  0xd8   :  { %1519 = vmatprep.subr.bf16.mxu1 %v2704_v36  ;;  %2047 = vmatpush1.bf16.msra.mxu0 %v2789_v47  ;;  %v2753_v36 = vld [vmem:[#allocation5 + $0x528] ss:$16 sps:$4 sm:$0xff]  }
  0xd9   :  { %2048 = vmatprep.subr.bf16.mxu0 %v2794_v49  ;;  %v2765_v47 = vld [vmem:[#allocation5 + $0x5a8] ss:$16 sps:$4 sm:$0xff]  }
  0xda   :  { %v2768_v49 = vld [vmem:[#allocation5 + $0x5c8] ss:$16 sps:$4 sm:$0xff]  }
  0xdb   :  { %1520 = vmatpush1.bf16.msra.mxu1 %v2702_v38  ;;  %v2824_v38 = vld [vmem:[#allocation7 + $0xf4] ss:$8 sps:$4 sm:$0xff]  }
  0xdc   :  { %1521 = vmatprep.subr.bf16.mxu1 %v2707_v40  ;;  %2049 = vmatpush1.bf16.msra.mxu0 %v2792_v51  ;;  %v2756_v40 = vld [vmem:[#allocation5 + $0x548] ss:$16 sps:$4 sm:$0xff]  }
  0xdd   :  { %2050 = vmatprep.subr.bf16.mxu0 %v2797_v54  ;;  %v2771_v51 = vld [vmem:[#allocation5 + $0x5e8] ss:$16 sps:$4 sm:$0xff]  }
  0xde   :  { %v2774_v54 = vld [vmem:[#allocation5 + $0x608] ss:$16 sps:$4 sm:$0xff]  }
  0xdf   :  { %1522 = vmatpush1.bf16.msra.mxu1 %v2705_v42  ;;  %v2759_v42 = vld [vmem:[#allocation5 + $0x568] ss:$16 sps:$4 sm:$0xff]  }
  0xe0   :  { %1523 = vmatprep.subr.bf16.mxu1 %v2710_v44  ;;  %2051 = vmatpush1.bf16.msra.mxu0 %v2795_v56  ;;  %v2764_v44 = vld [vmem:[#allocation5 + $0x58c] ss:$16 sps:$4 sm:$0xff]  }
  0xe1   :  { %2052 = vmatprep.subr.bf16.mxu0 %v2800_v58 }
  0xe3   :  { %1524 = vmatpush1.bf16.msra.mxu1 %v2708_v46  ;;  %v2767_v46 = vld [vmem:[#allocation5 + $0x5ac] ss:$16 sps:$4 sm:$0xff]  }
  0xe4   :  { %1525 = vmatprep.subr.bf16.mxu1 %v2713_v48  ;;  %2053 = vmatpush1.bf16.msra.mxu0 %v2798_v60  ;;  %v2770_v48 = vld [vmem:[#allocation5 + $0x5cc] ss:$16 sps:$4 sm:$0xff]  }
  0xe5   :  { %2054 = vmatprep.subr.bf16.mxu0 %v2803_v62 }
  0xe7   :  { %1526 = vmatpush1.bf16.msra.mxu1 %v2711_v50  ;;  %v2773_v50 = vld [vmem:[#allocation5 + $0x5ec] ss:$16 sps:$4 sm:$0xff]  }
  0xe8   :  { %1527 = vmatprep.subr.bf16.mxu1 %v2716_v53  ;;  %2055 = vmatpush1.bf16.msra.mxu0 %v2801_v0  ;;  %v2776_v53 = vld [vmem:[#allocation5 + $0x60c] ss:$16 sps:$4 sm:$0xff]  }
  0xe9   :  { %2056 = vmatprep.subr.bf16.mxu0 %v2806_v2 }
  0xeb   :  { %1528 = vmatpush1.bf16.msra.mxu1 %v2714_v55 }
  0xec   :  { %1529 = vmatprep.subr.bf16.mxu1 %v2719_v57  ;;  %2057 = vmatpush1.bf16.msra.mxu0 %v2804_v4 }
  0xed   :  { %2058 = vmatprep.subr.bf16.mxu0 %v2809_v6 }
  0xef   :  { %1530 = vmatpush1.bf16.msra.mxu1 %v2717_v59  ;;  %v270_v59 = vlaneseq }
  0xf0   :  { %1531 = vmatprep.subr.bf16.mxu1 %v2722_v61  ;;  %2059 = vmatpush1.bf16.msra.mxu0 %v2807_v11 }
  0xf1   :  { %2060 = vmatprep.subr.bf16.mxu0 %v2812_v12  ;;  %v3072_v60 = vshrl.u32 %v270_v59, 7 }
  0xf3   :  { %1532 = vmatpush1.bf16.msra.mxu1 %v2720_v63  ;;  %v3075_v61 = vsub.s32 0, %v3072_v60 }
  0xf4   :  { %1533 = vmatprep.subr.bf16.mxu1 %v2725_v1  ;;  %2061 = vmatpush1.bf16.msra.mxu0 %v2810_v16 }
  0xf5   :  { %2062 = vmatprep.subr.bf16.mxu0 %v2815_v17  ;;  %v2830_v17 = vld [vmem:[#allocation7 + $0x114] ss:$8 sps:$4 sm:$0xff]  }
  0xf7   :  { %1534 = vmatpush1.bf16.msra.mxu1 %v2723_v3 }
  0xf8   :  { %1544 = vmatprep.subr.bf16.mxu1 %v2728_v5  ;;  %2063 = vmatpush1.bf16.msra.mxu0 %v2813_v21  ;;  %v2831_v21 = vld [vmem:[#allocation7 + $0x120] ss:$8 sps:$4 sm:$0xff]  }
  0xf9   :  { %2064 = vmatprep.subr.bf16.mxu0 %v2818_v22  ;;  %v2836_v22 = vld [vmem:[#allocation7 + $0x134] ss:$8 sps:$4 sm:$0xff]  }
  0xfa   :  { %1536 = vmatmul.mubr.bf16.vlgmr.msra.gmra.mrb[4].mxu1 %v3042_v8  ;;  %v2735_v8 = vld [vmem:[#allocation5 + $0x468] ss:$16 sps:$4 sm:$0xff]  }
  0xfb   :  { %1545 = vmatpush1.bf16.msra.mxu1 %v2726_v9  ;;  %1576 = vmatprep.mubr.bf16.mxu1 %v3051_v35  ;;  %v2816_v35 = vld [vmem:[#allocation7 + $0xd0] ss:$8 sps:$4 sm:$0xff]  }
  0xfc   :  { %1546 = vmatprep.subr.bf16.mxu1 %v2731_v10  ;;  %2065 = vmatpush1.bf16.msra.mxu0 %v2816_v35  ;;  %v2837_v35 = vld [vmem:[#allocation7 + $0x140] ss:$8 sps:$4 sm:$0xff]  }
  0xfd   :  { %2066 = vmatprep.subr.bf16.mxu0 %v2821_v33  ;;  %v2857_v33 = vld [vmem:[#allocation7 + $0x1a4] ss:$8 sps:$4 sm:$0xff]  }
  0xff   :  { %1547 = vmatpush1.bf16.msra.mxu1 %v2729_v13 }
 0x100   :  { %1548 = vmatprep.subr.bf16.mxu1 %v2734_v15  ;;  %2067 = vmatpush1.bf16.msra.mxu0 %v2819_v34  ;;  %v2825_v15 = vld [vmem:[#allocation7 + $0x100] ss:$8 sps:$4 sm:$0xff]  }
 0x101   :  { %2068 = vmatprep.subr.bf16.mxu0 %v2824_v38  ;;  %v2855_v34 = vld [vmem:[#allocation7 + $0x1a0] ss:$8 sps:$4 sm:$0xff]   ;;  %v2863_v38 = vld [vmem:[#allocation7 + $0x1c4] ss:$8 sps:$4 sm:$0xff]  }
 0x103   :  { %1549 = vmatpush1.bf16.msra.mxu1 %v2732_v18  ;;  %v2828_v18 = vld [vmem:[#allocation7 + $0x110] ss:$8 sps:$4 sm:$0xff]  }
 0x104   :  { %1550 = vmatprep.subr.bf16.mxu1 %v2737_v19  ;;  %2069 = vmatpush1.bf16.msra.mxu0 %v2822_v39  ;;  %v2833_v19 = vld [vmem:[#allocation7 + $0x124] ss:$8 sps:$4 sm:$0xff]   ;;  %v2861_v39 = vld [vmem:[#allocation7 + $0x1c0] ss:$8 sps:$4 sm:$0xff]  }
 0x105   :  { %2079 = vmatprep.subr.bf16.mxu0 %v2827_v43  ;;  %v2867_v43 = vld [vmem:[#allocation7 + $0x1e0] ss:$8 sps:$4 sm:$0xff]  }
 0x107   :  { %1551 = vmatpush1.bf16.msra.mxu1 %v2735_v8  ;;  %v2834_v8 = vld [vmem:[#allocation7 + $0x130] ss:$8 sps:$4 sm:$0xff]  }
 0x108   :  { %1552 = vmatprep.subr.bf16.mxu1 %v2740_v24  ;;  %v2839_v24 = vld [vmem:[#allocation7 + $0x144] ss:$8 sps:$4 sm:$0xff]  }
 0x10b   :  { %1553 = vmatpush1.bf16.msra.mxu1 %v2738_v25  ;;  %v2842_v25 = vld [vmem:[#allocation7 + $0x154] ss:$8 sps:$4 sm:$0xff]  }
 0x10c   :  { %1554 = vmatprep.subr.bf16.mxu1 %v2743_v7  ;;  %v2840_v7 = vld [vmem:[#allocation7 + $0x150] ss:$8 sps:$4 sm:$0xff]  }
 0x10f   :  { %1555 = vmatpush1.bf16.msra.mxu1 %v2741_v26  ;;  %v2845_v26 = vld [vmem:[#allocation7 + $0x164] ss:$8 sps:$4 sm:$0xff]  }
 0x110   :  { %1556 = vmatprep.subr.bf16.mxu1 %v2746_v27  ;;  %v2843_v27 = vld [vmem:[#allocation7 + $0x160] ss:$8 sps:$4 sm:$0xff]  }
 0x113   :  { %1557 = vmatpush1.bf16.msra.mxu1 %v2744_v28  ;;  %v2848_v28 = vld [vmem:[#allocation7 + $0x174] ss:$8 sps:$4 sm:$0xff]  }
 0x114   :  { %1558 = vmatprep.subr.bf16.mxu1 %v2749_v52  ;;  %v2846_v52 = vld [vmem:[#allocation7 + $0x170] ss:$8 sps:$4 sm:$0xff]  }
 0x117   :  { %1559 = vmatpush1.bf16.msra.mxu1 %v2747_v29  ;;  %v2851_v29 = vld [vmem:[#allocation7 + $0x184] ss:$8 sps:$4 sm:$0xff]  }
 0x118   :  { %1560 = vmatprep.subr.bf16.mxu1 %v2752_v30  ;;  %v2849_v30 = vld [vmem:[#allocation7 + $0x180] ss:$8 sps:$4 sm:$0xff]  }
 0x11b   :  { %1561 = vmatpush1.bf16.msra.mxu1 %v2750_v31  ;;  %v2854_v31 = vld [vmem:[#allocation7 + $0x194] ss:$8 sps:$4 sm:$0xff]  }
 0x11c   :  { %1562 = vmatprep.subr.bf16.mxu1 %v2755_v32  ;;  %v2852_v32 = vld [vmem:[#allocation7 + $0x190] ss:$8 sps:$4 sm:$0xff]  }
 0x11f   :  { %1563 = vmatpush1.bf16.msra.mxu1 %v2753_v36  ;;  %v2860_v36 = vld [vmem:[#allocation7 + $0x1b4] ss:$8 sps:$4 sm:$0xff]  }
 0x120   :  { %1564 = vmatprep.subr.bf16.mxu1 %v2758_v37  ;;  %v2858_v37 = vld [vmem:[#allocation7 + $0x1b0] ss:$8 sps:$4 sm:$0xff]  }
 0x123   :  { %1565 = vmatpush1.bf16.msra.mxu1 %v2756_v40  ;;  %v2866_v40 = vld [vmem:[#allocation7 + $0x1d4] ss:$8 sps:$4 sm:$0xff]  }
 0x124   :  { %1566 = vmatprep.subr.bf16.mxu1 %v2761_v41  ;;  %v2864_v41 = vld [vmem:[#allocation7 + $0x1d0] ss:$8 sps:$4 sm:$0xff]  }
 0x127   :  { %1567 = vmatpush1.bf16.msra.mxu1 %v2759_v42  ;;  %v2869_v42 = vld [vmem:[#allocation7 + $0x1e4] ss:$8 sps:$4 sm:$0xff]  }
 0x128   :  { %1568 = vmatprep.subr.bf16.mxu1 %v2764_v44  ;;  %v2872_v44 = vld [vmem:[#allocation7 + $0x1f4] ss:$8 sps:$4 sm:$0xff]  }
 0x12b   :  { %1569 = vmatpush1.bf16.msra.mxu1 %v2762_v45  ;;  %v2870_v45 = vld [vmem:[#allocation7 + $0x1f0] ss:$8 sps:$4 sm:$0xff]  }
 0x12c   :  { %1570 = vmatprep.subr.bf16.mxu1 %v2767_v46  ;;  %v280_v46 = vsub.s32 2, %v3072_v60 }
 0x12f   :  { %1571 = vmatpush1.bf16.msra.mxu1 %v2765_v47  ;;  %v284_v47 = vsub.s32 3, %v3072_v60 }
 0x130   :  { %1572 = vmatprep.subr.bf16.mxu1 %v2770_v48 }
 0x133   :  { %1573 = vmatpush1.bf16.msra.mxu1 %v2768_v49 }
 0x134   :  { %1574 = vmatprep.subr.bf16.mxu1 %v2773_v50 }
 0x137   :  { %1575 = vmatpush1.bf16.msra.mxu1 %v2771_v51 }
 0x138   :  { %1585 = vmatprep.subr.bf16.mxu1 %v2776_v53 }
 0x13a   :  { %1577 = vmatmul.mubr.bf16.vlgmr.msra.gmra.mrb[4].mxu1 %v3056_v14  ;;  %v3080_v14 = vld [vmem:[%s3108_s2] sm:$0xf] }
 0x13b   :  { %1586 = vmatpush1.bf16.msra.mxu1 %v2774_v54  ;;  %1617 = vmatprep.mubr.bf16.mxu1 %v2954_v20  ;;  %v3083_v20 = vsub.s32 1, %v3072_v60  ;;  %v281_v48 = vrot.slane %v3080_v14, %v280_v46  ;;  %v285_v49 = vrot.slane %v3080_v14, %v284_v47  ;;  %v1706_v60 = vld [vmem:[%s3110_s4] sm:$0x3] }
 0x13d   :  { %v277_v62 = vrot.slane %v3080_v14, %v3083_v20 }
 0x146   :  { %2369 = vmatmul.mubr.msk.bf16.vlgmr.msra.gmra.mrb[4].mxu1 %vm1294_vm0, %v3062_v23  ;;  %v273_v23 = vrot.slane %v3080_v14, %v3075_v61  ;;  %v1711_v14 = vrot.slane %v1706_v60, %v3075_v61 }
 0x14d   :  { %v1332_v55 = vpop.f32.mrb[0].mxu1 }
 0x14e   :  { %v1334_v56 = vpop.f32.mrb[1].mxu1  ;;  %v1333_v63 = vadd.f32 %v1332_v55, %v273_v23 }
 0x14f   :  { %v1336_v57 = vpop.f32.mrb[2].mxu1  ;;  %v1335_v0 = vadd.f32 %v1334_v56, %v277_v62 }
 0x150   :  { %v1337_v58 = vpop.f32.mrb[3].mxu1 }
 0x19a   :  { %v1455_v1 = vpop.f32.mrb[0].mxu0 }
 0x19b   :  { %v2437_v2 = vadd.f32 %v1455_v1, %v1333_v63  ;;  %v1457_v3 = vpop.f32.mrb[1].mxu0  ;;  %v2126_v1 = vld [vmem:[%s3111_s5] sm:$0x3] }
 0x19c   :  { %v2439_v4 = vadd.f32 %v1457_v3, %v1335_v0  ;;  %v1459_v5 = vpop.f32.mrb[2].mxu0  ;;  %v1715_v0 = vrot.slane %v1706_v60, %v3083_v20 }
 0x19d   :  { %vm1626_vm1 = vcmp.gt.f32.partialorder %v2437_v2, 0.0  ;;  %v1630_v6 = vmul.f32 0.2, %v2437_v2  ;;  %v1460_v9 = vpop.f32.mrb[3].mxu0 }
 0x19e   :  { %vm1627_vm2 = vcmp.gt.f32.partialorder %v2439_v4, 0.0  ;;  %v1631_v10 = vmul.f32 0.2, %v2439_v4  ;;  %v2131_v9 = vrot.slane %v2126_v1, %v3075_v61 }
 0x19f   :  { %v1634_v11 = vsel %vm1626_vm1, %v2437_v2, %v1630_v6 }
 0x1a0   :  { %v1635_v12 = vsel %vm1627_vm2, %v2439_v4, %v1631_v10  ;;  %v1638_v16 = vpack.c.bf16 %v1634_v11, %v1634_v11 }
 0x1a1   :  { %v1639_v13 = vpack.c.bf16 %v1635_v12, %v1635_v12  ;;  %v2135_v12 = vrot.slane %v2126_v1, %v3083_v20 }
 0x1a3   :  { %2070 = vmatprep.mubr.bf16.mxu0 %v1639_v13 }
 0x1a4   :  { %2071 = vmatmul.mubr.bf16.vlgmr.msra.gmra.mrb[4].mxu0 %v1638_v16 }
 0x1a5   :  { %2080 = vmatpush1.bf16.msra.mxu0 %v2825_v15 }
 0x1a6   :  { %2081 = vmatprep.subr.bf16.mxu0 %v2830_v17 }
 0x1a9   :  { %2082 = vmatpush1.bf16.msra.mxu0 %v2828_v18 }
 0x1aa   :  { %2083 = vmatprep.subr.bf16.mxu0 %v2833_v19 }
 0x1ad   :  { %2084 = vmatpush1.bf16.msra.mxu0 %v2831_v21  ;;  %v2434_v21 = vld [vmem:[#allocation2] ss:$0 sm:$0xff] }
 0x1ae   :  { %2085 = vmatprep.subr.bf16.mxu0 %v2836_v22 }
 0x1b1   :  { %2086 = vmatpush1.bf16.msra.mxu0 %v2834_v8 }
 0x1b2   :  { %2087 = vmatprep.subr.bf16.mxu0 %v2839_v24 }
 0x1b5   :  { %2088 = vmatpush1.bf16.msra.mxu0 %v2837_v35 }
 0x1b6   :  { %2089 = vmatprep.subr.bf16.mxu0 %v2842_v25 }
 0x1b9   :  { %2090 = vmatpush1.bf16.msra.mxu0 %v2840_v7 }
 0x1ba   :  { %2091 = vmatprep.subr.bf16.mxu0 %v2845_v26 }
 0x1bd   :  { %2092 = vmatpush1.bf16.msra.mxu0 %v2843_v27 }
 0x1be   :  { %2093 = vmatprep.subr.bf16.mxu0 %v2848_v28 }
 0x1c1   :  { %2094 = vmatpush1.bf16.msra.mxu0 %v2846_v52 }
 0x1c2   :  { %2095 = vmatprep.subr.bf16.mxu0 %v2851_v29 }
 0x1c5   :  { %2096 = vmatpush1.bf16.msra.mxu0 %v2849_v30 }
 0x1c6   :  { %2097 = vmatprep.subr.bf16.mxu0 %v2854_v31 }
 0x1c9   :  { %2098 = vmatpush1.bf16.msra.mxu0 %v2852_v32 }
 0x1ca   :  { %2099 = vmatprep.subr.bf16.mxu0 %v2857_v33 }
 0x1cd   :  { %2100 = vmatpush1.bf16.msra.mxu0 %v2855_v34 }
 0x1ce   :  { %2101 = vmatprep.subr.bf16.mxu0 %v2860_v36 }
 0x1d1   :  { %2102 = vmatpush1.bf16.msra.mxu0 %v2858_v37 }
 0x1d2   :  { %2103 = vmatprep.subr.bf16.mxu0 %v2863_v38 }
 0x1d5   :  { %2104 = vmatpush1.bf16.msra.mxu0 %v2861_v39 }
 0x1d6   :  { %2105 = vmatprep.subr.bf16.mxu0 %v2866_v40 }
 0x1d9   :  { %2106 = vmatpush1.bf16.msra.mxu0 %v2864_v41 }
 0x1da   :  { %2107 = vmatprep.subr.bf16.mxu0 %v2869_v42 }
 0x1dd   :  { %2108 = vmatpush1.bf16.msra.mxu0 %v2867_v43 }
 0x1de   :  { %2109 = vmatprep.subr.bf16.mxu0 %v2872_v44 }
 0x1e1   :  { %2110 = vmatpush1.bf16.msra.mxu0 %v2870_v45 }
 0x219   :  { %v1619_v50 = vpop.f32.mrb[4].mxu1 }
 0x21a   :  { %v2440_v51 = vadd.f32 %v1619_v50, %v281_v48  ;;  %v1621_v53 = vpop.f32.mrb[5].mxu1 }
 0x21b   :  { %v2441_v54 = vadd.f32 %v1621_v53, %v285_v49  ;;  %v1623_v55 = vpop.f32.mrb[6].mxu1 }
 0x21c   :  { %vm1628_vm3 = vcmp.gt.f32.partialorder %v2440_v51, 0.0  ;;  %v1632_v56 = vmul.f32 0.2, %v2440_v51  ;;  %v1624_v57 = vpop.f32.mrb[7].mxu1 }
 0x21d   :  { %vm1629_vm4 = vcmp.gt.f32.partialorder %v2441_v54, 0.0  ;;  %v1633_v58 = vmul.f32 0.2, %v2441_v54 }
 0x21e   :  { %v1636_v59 = vsel %vm1628_vm3, %v2440_v51, %v1632_v56 }
 0x21f   :  { %v1637_v23 = vsel %vm1629_vm4, %v2441_v54, %v1633_v58  ;;  %v1640_v63 = vpack.c.bf16 %v1636_v59, %v1636_v59 }
 0x220   :  { %v1641_v62 = vpack.c.bf16 %v1637_v23, %v1637_v23 }
 0x222   :  { %2111 = vmatprep.mubr.bf16.mxu0 %v1641_v62 }
 0x223   :  { %2112 = vmatmul.mubr.bf16.vlgmr.msra.gmra.mrb[4].mxu0 %v1640_v63 }
 0x2f6   :  { %v2113_v2 = vpop.f32.mrb[4].mxu0 }
 0x2f7   :  { %v2442_v3 = vadd.f32 %v2113_v2, %v1711_v14  ;;  %v2115_v4 = vpop.f32.mrb[5].mxu0 }
 0x2f8   :  { %v2443_v5 = vadd.f32 %v2115_v4, %v1715_v0  ;;  %v2117_v6 = vpop.f32.mrb[6].mxu0 }
 0x2f9   :  { %vm2120_vm5 = vcmp.gt.f32.partialorder %v2442_v3, 0.0  ;;  %v2122_v10 = vmul.f32 0.2, %v2442_v3  ;;  %v2118_v11 = vpop.f32.mrb[7].mxu0 }
 0x2fa   :  { %vm2121_vm6 = vcmp.gt.f32.partialorder %v2443_v5, 0.0  ;;  %v2123_v13 = vmul.f32 0.2, %v2443_v5 }
 0x2fb   :  { %v2124_v15 = vsel %vm2120_vm5, %v2442_v3, %v2122_v10 }
 0x2fc   :  { %v2125_v16 = vsel %vm2121_vm6, %v2443_v5, %v2123_v13  ;;  %v2138_v17 = vmul.f32 %v2131_v9, %v2124_v15 }
 0x2fd   :  { %v2139_v18 = vmul.f32 %v2135_v12, %v2125_v16 }
 0x2ff   :  { %v2140_v19 = vadd.f32 %v2139_v18, %v2138_v17 }
 0x301   :  { %2141 = vadd.xlane.f32.xlu0 %v2140_v19 }
 0x38e   :  { %v2142_v22 = vpop.xlane.xlu0 %2141 }
 0x38f   :  { %v2150_v8 = vadd.f32 %v2434_v21, %v2142_v22 }
 0x391   :  { %v2435_v24 = vmul.f32 -1.442695, %v2150_v8 }
 0x393   :  { %2873 = vpow2.f32 %v2435_v24 }
 0x39d   :  { %v2874_v35 = vpop.eup %2873 }
 0x39e   :  { %v2154_v61 = vadd.f32 1.0, %v2874_v35 }
 0x3a0   :  { %2875 = vrcp.f32 %v2154_v61 }
 0x3aa   :  { %v2876_v25 = vpop.eup %2875 }
 0x3ab   :  { %2158 = vst.msk [vmem:[%s3113_s7] sm:$0xff] %vm2157_vm7, %v2876_v25 }
 0x3ac   :  { %2163 = vsyncpa [#allocation4], 1 }
 0x3ad   :  { %2164 = vsyncpa [#allocation6], 1 }

</bundles_post_ra>
